<compile_context>
chip_gen: v5e
topology: v5e:2x2
jax: 0.10.0
libtpu: 0.0.40
codegen_flags: <defaults>
</compile_context>

<pallas_src>
import jax
import jax.numpy as jnp
from jax.experimental import pallas as pl
from jax.experimental.pallas import tpu as pltpu

# Constants (match kornia / PyTorch semantics exactly)
_XYZ_REF_WHITE = (0.95047, 1.0, 1.08883)
_U_W = 4.0 * _XYZ_REF_WHITE[0] / (_XYZ_REF_WHITE[0] + 15.0 * _XYZ_REF_WHITE[1] + 3.0 * _XYZ_REF_WHITE[2])
_V_W = 9.0 * _XYZ_REF_WHITE[1] / (_XYZ_REF_WHITE[0] + 15.0 * _XYZ_REF_WHITE[1] + 3.0 * _XYZ_REF_WHITE[2])
_EPS = 2.220446049250313e-16  # torch.finfo(torch.float64).eps (as in the spec)

# kornia xyz_to_rgb linear transform coefficients
_M = (
    (3.2404813432005266, -1.5371515162713185, -0.49853632616888777),
    (-0.9692549499965682, 1.8759900014898907, 0.04155592655829284),
    (0.05564663913517715, -0.20404133836651123, 1.0573110696453443),
)

_INV_GAMMA = 1.0 / 2.4


def _round_up(x: int, m: int) -> int:
    return (x + m - 1) // m * m


def _luv_to_rgb_kernel(img_ref, out_ref):
    # img_ref / out_ref block shape: (1, 3, TR, LW)
    L = img_ref[0, 0, :, :]
    u = img_ref[0, 1, :, :]
    v = img_ref[0, 2, :, :]

    # Luv -> XYZ
    # Explicit cube instead of pow(x, 3.0): exact, and keeps work off the EUP.
    t = (L + 16.0) * (1.0 / 116.0)
    y = jnp.where(L > 7.999625, t * t * t, L * (1.0 / 903.3))

    # One shared reciprocal for both a and d (cuts 2 divides -> 1).
    inv_13L = 1.0 / (13.0 * L + _EPS)
    a = _U_W + u * inv_13L
    d = _V_W + v * inv_13L
    c = 3.0 * y * (5.0 * d - 3.0)
    z = ((a - 4.0) * c - 15.0 * a * d * y) / (12.0 * d + _EPS)
    x = -(c / (d + _EPS) + 3.0 * z)

    # XYZ -> linear RGB, then sRGB gamma. Written straight to out_ref to keep
    # live block-sized temporaries to a minimum.
    def _gamma(ch):
        return jnp.where(ch > 0.0031308,
                         1.055 * jnp.power(ch, _INV_GAMMA) - 0.055,
                         12.92 * ch)

    rs = _M[0][0] * x + _M[0][1] * y + _M[0][2] * z
    out_ref[0, 0, :, :] = _gamma(rs)
    gs = _M[1][0] * x + _M[1][1] * y + _M[1][2] * z
    out_ref[0, 1, :, :] = _gamma(gs)
    bs = _M[2][0] * x + _M[2][1] * y + _M[2][2] * z
    out_ref[0, 2, :, :] = _gamma(bs)


def luv_to_rgb(image: jax.Array,
               *,
               lane_width: int = 512,
               max_rows_per_block: int = 256) -> jax.Array:
    """image: (*, 3, H, W) float32 Luv image -> (*, 3, H, W) RGB."""
    if image.ndim < 3 or image.shape[-3] != 3:
        raise ValueError(f"Input size must have a shape of (*, 3, H, W). Got {image.shape}")

    orig_shape = image.shape
    H, W = orig_shape[-2], orig_shape[-1]
    lead = 1
    for s in orig_shape[:-3]:
        lead *= s
    lead = max(lead, 1)

    # Flatten the spatial dims to a lane-dense 2D layout (rows, LW).
    P = H * W
    LW = min(lane_width, _round_up(P, 128))          # multiple of 128
    R = pl.cdiv(P, LW)                                # rows needed
    TR = min(max_rows_per_block, R)
    if TR < R:
        TR = max(8, (TR // 8) * 8)                    # sublane-aligned tile rows
    R_pad = _round_up(R, TR)
    P_pad = R_pad * LW

    flat = image.reshape(lead, 3, P)
    if P_pad != P:
        # Zero padding is numerically benign for this formula and is sliced off.
        flat = jnp.pad(flat, ((0, 0), (0, 0), (0, P_pad - P)))
    x4 = flat.reshape(lead, 3, R_pad, LW)

    grid = (lead, R_pad // TR)
    block = (1, 3, TR, LW)

    out = pl.pallas_call(
        _luv_to_rgb_kernel,
        out_shape=jax.ShapeDtypeStruct((lead, 3, R_pad, LW), image.dtype),
        grid=grid,
        in_specs=[pl.BlockSpec(block, lambda b, r: (b, 0, r, 0))],
        out_specs=pl.BlockSpec(block, lambda b, r: (b, 0, r, 0)),
        compiler_params=pltpu.CompilerParams(
            dimension_semantics=("parallel", "parallel"),
            vmem_limit_bytes=32 * 1024 * 1024,
        ),
    )(x4)

    out = out.reshape(lead, 3, P_pad)[:, :, :P]
    return out.reshape(orig_shape)


def _luv_to_rgb_ref(image: jax.Array) -> jax.Array:
    """Pure-JAX reference (mirrors the PyTorch code) for correctness check."""
    L = image[..., 0, :, :]
    u = image[..., 1, :, :]
    v = image[..., 2, :, :]
    y = jnp.where(L > 7.999625, jnp.power((L + 16.0) / 116.0, 3.0), L / 903.3)
    a = _U_W + u / (13.0 * L + _EPS)
    d = _V_W + v / (13.0 * L + _EPS)
    c = 3.0 * y * (5.0 * d - 3.0)
    z = ((a - 4.0) * c - 15.0 * a * d * y) / (12.0 * d + _EPS)
    x = -(c / (d + _EPS) + 3.0 * z)
    rs = _M[0][0] * x + _M[0][1] * y + _M[0][2] * z
    gs = _M[1][0] * x + _M[1][1] * y + _M[1][2] * z
    bs = _M[2][0] * x + _M[2][1] * y + _M[2][2] * z

    def _gamma(ch):
        return jnp.where(ch > 0.0031308, 1.055 * jnp.power(ch, 1.0 / 2.4) - 0.055, 12.92 * ch)

    return jnp.stack((_gamma(rs), _gamma(gs), _gamma(bs)), axis=-3)


if __name__ == "__main__":
    key = jax.random.PRNGKey(0)
    B, C, Himg, Wimg = 2, 3, 16, 16
    k1, k2, k3 = jax.random.split(key, 3)
    # Construct a plausible Luv image: L in [0, 100], u/v in [-100, 100]
    L = jax.random.uniform(k1, (B, 1, Himg, Wimg), jnp.float32, 0.0, 100.0)
    u = jax.random.uniform(k2, (B, 1, Himg, Wimg), jnp.float32, -100.0, 100.0)
    v = jax.random.uniform(k3, (B, 1, Himg, Wimg), jnp.float32, -100.0, 100.0)
    luv = jnp.concatenate([L, u, v], axis=1)

    out = luv_to_rgb(luv)
    jax.block_until_ready(out)

    ref = _luv_to_rgb_ref(luv)
    # NaN-safe, mixed abs/rel comparison (Mosaic transcendental approximations
    # differ slightly from XLA's; intermediates can be O(10) near L ~ 0).
    diff = jnp.abs(jnp.nan_to_num(out - ref, nan=0.0, posinf=0.0, neginf=0.0))
    denom = 1.0 + jnp.abs(jnp.nan_to_num(ref, nan=0.0, posinf=0.0, neginf=0.0))
    err = float(jnp.max(diff / denom))
    assert out.shape == (B, C, Himg, Wimg)
    assert err < 1e-3, f"max mixed abs/rel diff {err}"
    print("KERNEL_OK")
</pallas_src>

<mosaic_0001>
module attributes {stable_mosaic.version = 11 : i64} {
  func.func @_luv_to_rgb_kernel(%arg0: i32, %arg1: i32, %arg2: memref<1x3x1x256xf32, #tpu.memory_space<vmem>>, %arg3: memref<1x3x1x256xf32, #tpu.memory_space<vmem>>) attributes {dimension_semantics = [#tpu.dimension_semantics<parallel>, #tpu.dimension_semantics<parallel>], iteration_bounds = array<i64: 2, 1>, scalar_prefetch = 0 : i64, scratch_operands = 0 : i64, tpu.core_type = #tpu.core_type<tc>, window_params = [{transform_indices = @transform_0, window_bounds = array<i64: 1, 3, 1, 256>}, {transform_indices = @transform_1, window_bounds = array<i64: 1, 3, 1, 256>}]} {
    %c0 = arith.constant 0 : index
    %c0_0 = arith.constant 0 : index
    %c0_1 = arith.constant 0 : index
    %c0_2 = arith.constant 0 : index
    %0 = vector.load %arg2[%c0, %c0_0, %c0_1, %c0_2] : memref<1x3x1x256xf32, #tpu.memory_space<vmem>>, vector<1x1x1x256xf32>
    %1 = vector.shape_cast %0 : vector<1x1x1x256xf32> to vector<1x256xf32>
    %c0_3 = arith.constant 0 : index
    %c1 = arith.constant 1 : index
    %c0_4 = arith.constant 0 : index
    %c0_5 = arith.constant 0 : index
    %2 = vector.load %arg2[%c0_3, %c1, %c0_4, %c0_5] : memref<1x3x1x256xf32, #tpu.memory_space<vmem>>, vector<1x1x1x256xf32>
    %3 = vector.shape_cast %2 : vector<1x1x1x256xf32> to vector<1x256xf32>
    %c0_6 = arith.constant 0 : index
    %c2 = arith.constant 2 : index
    %c0_7 = arith.constant 0 : index
    %c0_8 = arith.constant 0 : index
    %4 = vector.load %arg2[%c0_6, %c2, %c0_7, %c0_8] : memref<1x3x1x256xf32, #tpu.memory_space<vmem>>, vector<1x1x1x256xf32>
    %5 = vector.shape_cast %4 : vector<1x1x1x256xf32> to vector<1x256xf32>
    %cst = arith.constant 1.600000e+01 : f32
    %6 = vector.broadcast %cst : f32 to vector<1x256xf32>
    %7 = arith.addf %1, %6 : vector<1x256xf32>
    %cst_9 = arith.constant 8.620690e-03 : f32
    %8 = vector.broadcast %cst_9 : f32 to vector<1x256xf32>
    %9 = arith.mulf %7, %8 : vector<1x256xf32>
    %cst_10 = arith.constant 7.9996252 : f32
    %10 = vector.broadcast %cst_10 : f32 to vector<1x256xf32>
    %11 = arith.cmpf ogt, %1, %10 : vector<1x256xf32>
    %12 = arith.mulf %9, %9 : vector<1x256xf32>
    %13 = arith.mulf %12, %9 : vector<1x256xf32>
    %cst_11 = arith.constant 0.00110705197 : f32
    %14 = vector.broadcast %cst_11 : f32 to vector<1x256xf32>
    %15 = arith.mulf %1, %14 : vector<1x256xf32>
    %16 = arith.select %11, %13, %15 : vector<1x256xi1>, vector<1x256xf32>
    %cst_12 = arith.constant 1.300000e+01 : f32
    %17 = vector.broadcast %cst_12 : f32 to vector<1x256xf32>
    %18 = arith.mulf %17, %1 : vector<1x256xf32>
    %cst_13 = arith.constant 2.22044605E-16 : f32
    %19 = vector.broadcast %cst_13 : f32 to vector<1x256xf32>
    %20 = arith.addf %18, %19 : vector<1x256xf32>
    %cst_14 = arith.constant 1.000000e+00 : f32
    %21 = vector.broadcast %cst_14 : f32 to vector<1x256xf32>
    %22 = arith.divf %21, %20 : vector<1x256xf32>
    %23 = arith.mulf %3, %22 : vector<1x256xf32>
    %cst_15 = arith.constant 0.197839826 : f32
    %24 = vector.broadcast %cst_15 : f32 to vector<1x256xf32>
    %25 = arith.addf %24, %23 : vector<1x256xf32>
    %26 = arith.mulf %5, %22 : vector<1x256xf32>
    %cst_16 = arith.constant 0.468336314 : f32
    %27 = vector.broadcast %cst_16 : f32 to vector<1x256xf32>
    %28 = arith.addf %27, %26 : vector<1x256xf32>
    %cst_17 = arith.constant 3.000000e+00 : f32
    %29 = vector.broadcast %cst_17 : f32 to vector<1x256xf32>
    %30 = arith.mulf %29, %16 : vector<1x256xf32>
    %cst_18 = arith.constant 5.000000e+00 : f32
    %31 = vector.broadcast %cst_18 : f32 to vector<1x256xf32>
    %32 = arith.mulf %31, %28 : vector<1x256xf32>
    %cst_19 = arith.constant 3.000000e+00 : f32
    %33 = vector.broadcast %cst_19 : f32 to vector<1x256xf32>
    %34 = arith.subf %32, %33 : vector<1x256xf32>
    %35 = arith.mulf %30, %34 : vector<1x256xf32>
    %cst_20 = arith.constant 4.000000e+00 : f32
    %36 = vector.broadcast %cst_20 : f32 to vector<1x256xf32>
    %37 = arith.subf %25, %36 : vector<1x256xf32>
    %38 = arith.mulf %37, %35 : vector<1x256xf32>
    %cst_21 = arith.constant 1.500000e+01 : f32
    %39 = vector.broadcast %cst_21 : f32 to vector<1x256xf32>
    %40 = arith.mulf %39, %25 : vector<1x256xf32>
    %41 = arith.mulf %40, %28 : vector<1x256xf32>
    %42 = arith.mulf %41, %16 : vector<1x256xf32>
    %43 = arith.subf %38, %42 : vector<1x256xf32>
    %cst_22 = arith.constant 1.200000e+01 : f32
    %44 = vector.broadcast %cst_22 : f32 to vector<1x256xf32>
    %45 = arith.mulf %44, %28 : vector<1x256xf32>
    %cst_23 = arith.constant 2.22044605E-16 : f32
    %46 = vector.broadcast %cst_23 : f32 to vector<1x256xf32>
    %47 = arith.addf %45, %46 : vector<1x256xf32>
    %48 = arith.divf %43, %47 : vector<1x256xf32>
    %cst_24 = arith.constant 2.22044605E-16 : f32
    %49 = vector.broadcast %cst_24 : f32 to vector<1x256xf32>
    %50 = arith.addf %28, %49 : vector<1x256xf32>
    %51 = arith.divf %35, %50 : vector<1x256xf32>
    %cst_25 = arith.constant 3.000000e+00 : f32
    %52 = vector.broadcast %cst_25 : f32 to vector<1x256xf32>
    %53 = arith.mulf %52, %48 : vector<1x256xf32>
    %54 = arith.addf %51, %53 : vector<1x256xf32>
    %cst_26 = arith.constant 0.000000e+00 : f32
    %55 = vector.broadcast %cst_26 : f32 to vector<1x256xf32>
    %56 = arith.subf %55, %54 : vector<1x256xf32>
    %cst_27 = arith.constant 3.24048138 : f32
    %57 = vector.broadcast %cst_27 : f32 to vector<1x256xf32>
    %58 = arith.mulf %57, %56 : vector<1x256xf32>
    %cst_28 = arith.constant -1.53715158 : f32
    %59 = vector.broadcast %cst_28 : f32 to vector<1x256xf32>
    %60 = arith.mulf %59, %16 : vector<1x256xf32>
    %61 = arith.addf %58, %60 : vector<1x256xf32>
    %cst_29 = arith.constant -0.498536319 : f32
    %62 = vector.broadcast %cst_29 : f32 to vector<1x256xf32>
    %63 = arith.mulf %62, %48 : vector<1x256xf32>
    %64 = arith.addf %61, %63 : vector<1x256xf32>
    %cst_30 = arith.constant 3.130800e-03 : f32
    %65 = vector.broadcast %cst_30 : f32 to vector<1x256xf32>
    %66 = arith.cmpf ogt, %64, %65 : vector<1x256xf32>
    %cst_31 = arith.constant 0.416666657 : f32
    %67 = vector.broadcast %cst_31 : f32 to vector<1x256xf32>
    %68 = math.powf %64, %67 : vector<1x256xf32>
    %cst_32 = arith.constant 1.055000e+00 : f32
    %69 = vector.broadcast %cst_32 : f32 to vector<1x256xf32>
    %70 = arith.mulf %69, %68 : vector<1x256xf32>
    %cst_33 = arith.constant 5.500000e-02 : f32
    %71 = vector.broadcast %cst_33 : f32 to vector<1x256xf32>
    %72 = arith.subf %70, %71 : vector<1x256xf32>
    %cst_34 = arith.constant 1.292000e+01 : f32
    %73 = vector.broadcast %cst_34 : f32 to vector<1x256xf32>
    %74 = arith.mulf %73, %64 : vector<1x256xf32>
    %75 = arith.select %66, %72, %74 : vector<1x256xi1>, vector<1x256xf32>
    %c0_35 = arith.constant 0 : index
    %c0_36 = arith.constant 0 : index
    %c0_37 = arith.constant 0 : index
    %c0_38 = arith.constant 0 : index
    %76 = vector.load %arg3[%c0_35, %c0_36, %c0_37, %c0_38] : memref<1x3x1x256xf32, #tpu.memory_space<vmem>>, vector<1x1x1x256xf32>
    %77 = vector.shape_cast %76 : vector<1x1x1x256xf32> to vector<1x256xf32>
    %78 = vector.shape_cast %75 : vector<1x256xf32> to vector<1x1x1x256xf32>
    tpu.vector_store %arg3[%c0_35, %c0_36, %c0_37, %c0_38], %78 {strides = array<i32>} : memref<1x3x1x256xf32, #tpu.memory_space<vmem>>, vector<1x1x1x256xf32>,
    %cst_39 = arith.constant -0.96925497 : f32
    %79 = vector.broadcast %cst_39 : f32 to vector<1x256xf32>
    %80 = arith.mulf %79, %56 : vector<1x256xf32>
    %cst_40 = arith.constant 1.875990e+00 : f32
    %81 = vector.broadcast %cst_40 : f32 to vector<1x256xf32>
    %82 = arith.mulf %81, %16 : vector<1x256xf32>
    %83 = arith.addf %80, %82 : vector<1x256xf32>
    %cst_41 = arith.constant 0.0415559262 : f32
    %84 = vector.broadcast %cst_41 : f32 to vector<1x256xf32>
    %85 = arith.mulf %84, %48 : vector<1x256xf32>
    %86 = arith.addf %83, %85 : vector<1x256xf32>
    %cst_42 = arith.constant 3.130800e-03 : f32
    %87 = vector.broadcast %cst_42 : f32 to vector<1x256xf32>
    %88 = arith.cmpf ogt, %86, %87 : vector<1x256xf32>
    %cst_43 = arith.constant 0.416666657 : f32
    %89 = vector.broadcast %cst_43 : f32 to vector<1x256xf32>
    %90 = math.powf %86, %89 : vector<1x256xf32>
    %cst_44 = arith.constant 1.055000e+00 : f32
    %91 = vector.broadcast %cst_44 : f32 to vector<1x256xf32>
    %92 = arith.mulf %91, %90 : vector<1x256xf32>
    %cst_45 = arith.constant 5.500000e-02 : f32
    %93 = vector.broadcast %cst_45 : f32 to vector<1x256xf32>
    %94 = arith.subf %92, %93 : vector<1x256xf32>
    %cst_46 = arith.constant 1.292000e+01 : f32
    %95 = vector.broadcast %cst_46 : f32 to vector<1x256xf32>
    %96 = arith.mulf %95, %86 : vector<1x256xf32>
    %97 = arith.select %88, %94, %96 : vector<1x256xi1>, vector<1x256xf32>
    %c0_47 = arith.constant 0 : index
    %c1_48 = arith.constant 1 : index
    %c0_49 = arith.constant 0 : index
    %c0_50 = arith.constant 0 : index
    %98 = vector.load %arg3[%c0_47, %c1_48, %c0_49, %c0_50] : memref<1x3x1x256xf32, #tpu.memory_space<vmem>>, vector<1x1x1x256xf32>
    %99 = vector.shape_cast %98 : vector<1x1x1x256xf32> to vector<1x256xf32>
    %100 = vector.shape_cast %97 : vector<1x256xf32> to vector<1x1x1x256xf32>
    tpu.vector_store %arg3[%c0_47, %c1_48, %c0_49, %c0_50], %100 {strides = array<i32>} : memref<1x3x1x256xf32, #tpu.memory_space<vmem>>, vector<1x1x1x256xf32>,
    %cst_51 = arith.constant 0.0556466393 : f32
    %101 = vector.broadcast %cst_51 : f32 to vector<1x256xf32>
    %102 = arith.mulf %101, %56 : vector<1x256xf32>
    %cst_52 = arith.constant -0.204041332 : f32
    %103 = vector.broadcast %cst_52 : f32 to vector<1x256xf32>
    %104 = arith.mulf %103, %16 : vector<1x256xf32>
    %105 = arith.addf %102, %104 : vector<1x256xf32>
    %cst_53 = arith.constant 1.05731106 : f32
    %106 = vector.broadcast %cst_53 : f32 to vector<1x256xf32>
    %107 = arith.mulf %106, %48 : vector<1x256xf32>
    %108 = arith.addf %105, %107 : vector<1x256xf32>
    %cst_54 = arith.constant 3.130800e-03 : f32
    %109 = vector.broadcast %cst_54 : f32 to vector<1x256xf32>
    %110 = arith.cmpf ogt, %108, %109 : vector<1x256xf32>
    %cst_55 = arith.constant 0.416666657 : f32
    %111 = vector.broadcast %cst_55 : f32 to vector<1x256xf32>
    %112 = math.powf %108, %111 : vector<1x256xf32>
    %cst_56 = arith.constant 1.055000e+00 : f32
    %113 = vector.broadcast %cst_56 : f32 to vector<1x256xf32>
    %114 = arith.mulf %113, %112 : vector<1x256xf32>
    %cst_57 = arith.constant 5.500000e-02 : f32
    %115 = vector.broadcast %cst_57 : f32 to vector<1x256xf32>
    %116 = arith.subf %114, %115 : vector<1x256xf32>
    %cst_58 = arith.constant 1.292000e+01 : f32
    %117 = vector.broadcast %cst_58 : f32 to vector<1x256xf32>
    %118 = arith.mulf %117, %108 : vector<1x256xf32>
    %119 = arith.select %110, %116, %118 : vector<1x256xi1>, vector<1x256xf32>
    %c0_59 = arith.constant 0 : index
    %c2_60 = arith.constant 2 : index
    %c0_61 = arith.constant 0 : index
    %c0_62 = arith.constant 0 : index
    %120 = vector.load %arg3[%c0_59, %c2_60, %c0_61, %c0_62] : memref<1x3x1x256xf32, #tpu.memory_space<vmem>>, vector<1x1x1x256xf32>
    %121 = vector.shape_cast %120 : vector<1x1x1x256xf32> to vector<1x256xf32>
    %122 = vector.shape_cast %119 : vector<1x256xf32> to vector<1x1x1x256xf32>
    tpu.vector_store %arg3[%c0_59, %c2_60, %c0_61, %c0_62], %122 {strides = array<i32>} : memref<1x3x1x256xf32, #tpu.memory_space<vmem>>, vector<1x1x1x256xf32>,
    return
  }
  func.func @transform_0(%arg0: i32, %arg1: i32) -> (i32, i32, i32, i32) {
    %c0_i32 = arith.constant 0 : i32
    %c0_i32_0 = arith.constant 0 : i32
    %c0_i32_1 = arith.constant 0 : i32
    return %arg0, %c0_i32, %arg1, %c0_i32_0 : i32, i32, i32, i32
  }
  func.func @transform_1(%arg0: i32, %arg1: i32) -> (i32, i32, i32, i32) {
    %c0_i32 = arith.constant 0 : i32
    %c0_i32_0 = arith.constant 0 : i32
    %c0_i32_1 = arith.constant 0 : i32
    return %arg0, %c0_i32, %arg1, %c0_i32_0 : i32, i32, i32, i32
  }
}

</mosaic_0001>

<bundles_post_ra>
// kernel: tpu_custom_call.1
= control target key start
LH: loop header
LB: loop body
LE: loop exit
PB: predicated region body
PF: predicated region fallthrough
CT: control target
= control target key end

     0   :  { %6 = vsyncpa [#allocation3], 0  ;;  %s1053_s0 = inlined_call_operand.hbm [shape: f32[2,3,1,256], index: 0, kind: input, shape index: {}]   ;;  %s1054_s1 = inlined_call_operand.hbm [shape: f32[2,3,1,256], index: 1, kind: output, shape index: {}]  }
   0x1   :  { %8 = vsyncpa [#allocation3 + $0x1], 0 }
   0x2   :  { %9 = vsyncpa [#allocation4], 0 }
   0x3   :  { %11 = vsyncpa [#allocation4 + $0x1], 0  ;;  %s816_s6 = smov 0   ;;  %s818_s7 = smov 0  }
   0x4   :  { %s820_s8 = smov 0   ;;  %s822_s9 = smov 0  }
   0x5   :  { %s824_s10 = smov 0   ;;  %s826_s11 = smov 0  }
   0x6 LB: > { %s377_s12 = sadd.s32 4294967295, %s800_s11   ;;  %s378_s13 = sadd.s32 4294967294, %s800_s11   ;;  %s800_s11 = sphi %s826_s11, %s17_s11   ;;  %s796_s10 = sphi %s824_s10, %s1065_s10   ;;  %s792_s9 = sphi %s822_s9, %s1064_s9   ;;  %s788_s8 = sphi %s820_s8, %s1063_s8   ;;  %s784_s7 = sphi %s818_s7, %s1062_s7   ;;  %s780_s6 = sphi %s816_s6, %s1061_s6  }
   0x7   : > { %s29_s14 = sadd.s32 1, %s796_s10  ;;  %s38_s15 = sadd.s32 1, %s788_s8 }
   0x8   : > { %p31_p0 = scmp.ge.s32.totalorder %s29_s14, 2  ;;  %p45_p1 = scmp.ne.s32.totalorder %s788_s8, %s784_s7 }
   0x9   : > { %p46_p2 = scmp.eq.s32.totalorder %s800_s11, 0  ;;  %p51_p3 = scmp.ne.s32.totalorder %s784_s7, %s780_s6 }
   0xa   : > { %s1067_s14 = smov (%p31_p0, %s29_s14), 0  ;;  %p52_p5 = scmp.eq.s32.totalorder %s377_s12, 0 }
   0xb   : > { %p857_p4 = por %p46_p2, %p45_p1  ;;  %s33_s17 = ssub.s32 %s796_s10, %s1067_s14 }
   0xc   : > { %p77_p6 = scmp.eq.s32.totalorder %s377_s12, 1  ;;  %p36_p7 = scmp.eq.s32.totalorder %s33_s17, 0 }
   0xd   : > { %p863_p8 = por %p52_p5, %p51_p3  ;;  %p83_p10 = scmp.eq.s32.totalorder %s378_s13, 1 }
   0xe   : > { %p867_p9 = por %p77_p6, %p45_p1  ;;  %p380_p12 = scmp.ge.s32.totalorder %s800_s11, 2 }
   0xf   : > { %s872_s20 = scalar_select %p36_p7, %s788_s8, %s38_s15  }
  0x10   : > { %p874_p11 = por %p83_p10, %p51_p3  ;;  %p622_p13 = scmp.lt.s32.totalorder %s800_s11, 2 }
  0x11   : > { %s103_s22 = sand.u32 1, %s788_s8   ;;  %s394_s24 = smul.u32 6, %s796_s10 }
  0x12   : > { %s393_s23 = smul.u32 6, %s103_s22  ;;  %p615_p0 = pnand %p622_p13, %p857_p4 }
  0x13   : > { %s113_s27 = scalar_lea.hbm %s1053_s0, %s394_s24  ;;  %p381_p1 = scmp.ge.s32.totalorder %s800_s11, 1 }
  0x14   : > { %s107_s28 = scalar_lea.vmem [#allocation2], %s393_s23  ;;  %s114_s30 = sshll.u32 %s113_s27, 4  ;;  %s115_s30 = int_to_ptr.hbm [resolvable:$true] %s114_s30 }
  0x15   : > { %s116_s29 = sshll.u32 %s107_s28, 4  ;;  %s104_s2 = scalar_lea.sflag [#allocation3], %s103_s22  ;;  %s117_s29 = int_to_ptr.vmem [resolvable:$true] %s116_s29 }
  0x16   : > { %s802_s3 = smov 32   ;;  %s803_s4 = smov 2  }
  0x17   : > { %617 = dma.hbm_to_vmem [thread:$0]  (!%p615_p0), %s115_s30, 96, %s117_s29, %s104_s2, %s802_s3, %s802_s3, %s803_s4  }
  0x18   : > { %p124_p2 = scmp.lt.s32.totalorder %s800_s11, 3 }
  0x1a   : > { %p125_p3 = pnand %p381_p1, %p124_p2 }
  0x1b   : > { %s890_s5 = sand.u32 (!%p125_p3), 1, %s784_s7  }
  0x1c   : > { %128 = sbr.rel (%p125_p3) target bundleno = 167 (0xa7), region = 24  ;;  %s131_s13 = scalar_lea.sflag (!%p125_p3), [#allocation3], %s890_s5 }
  0x1d   : > { %s395_s12 = smul.u32 (!%p125_p3), 6, %s890_s5 }
  0x1f   : > { %s134_s15 = scalar_lea.vmem (!%p125_p3), [#allocation2], %s395_s12 }
  0x21   : > { %771 = dma.done.wait (%p863_p8), %s131_s13, 96  }
  0x22   : > { %773 = vsyncadd (%p863_p8), %s131_s13, 4294967200  ;;  %v154_v0 = vld [vmem:[%s134_s15] sm:$0x3]  ;;  %v382_v13 = vld [vmem:[%s134_s15 + $0x2] sm:$0x3]  ;;  %s609_s16 = smul.u32 6, %s792_s9 }
  0x23   : > { %v166_v1 = vmul.f32 13.0, %v154_v0  ;;  %v159_v4 = vadd.f32 16.0, %v154_v0  ;;  %v383_v14 = vld [vmem:[%s134_s15 + $0x4] sm:$0x3]  ;;  %v164_v21 = vmul.f32 0.001107052, %v154_v0 }
  0x24   : > { %vm161_vm4 = vcmp.gt.f32.partialorder %v154_v0, 7.999625  ;;  %s153_s9 = scalar_lea.vmem [#allocation5], %s395_s12  ;;  %s288_s22 = scalar_lea.hbm %s1054_s1, %s609_s16 }
  0x25   : > { %v167_v2 = vadd.f32 2.220446e-16, %v166_v1  ;;  %v160_v9 = vmul.f32 0.00862069, %v159_v4  ;;  %s289_s23 = sshll.u32 %s153_s9, 4  ;;  %s291_s24 = sshll.u32 %s288_s22, 4  ;;  %s290_s23 = int_to_ptr.vmem [resolvable:$true] %s289_s23  ;;  %s292_s24 = int_to_ptr.hbm [resolvable:$true] %s291_s24 }
  0x26   : > { %s276_s25 = scalar_lea.sflag [#allocation4], %s890_s5  ;;  %s732_s26 = sshra.s32 %s292_s24, 4  ;;  %s733_s26 = int_to_ptr.hbm [resolvable:$true] %s732_s26 }
  0x27   : > { %676 = vrcp.f32 %v167_v2  ;;  %v179_v6 = vand.u32 2147483648, %v167_v2  ;;  %vm173_vm0 = vweird.f32 %v167_v2  ;;  %v177_v8 = vand.u32 2147483647, %v167_v2  ;;  %s734_s27 = scalar_lea.hbm %s733_s26, 6  ;;  %s738_s30 = scalar_lea.hbm %s1054_s1, 12 }
  0x28   : > { %v162_v15 = vmul.f32 %v160_v9, %v160_v9  ;;  %p735_p4 = scmp.ne.s32.totalorder %s733_s26, %s734_s27  ;;  %p739_p7 = scmp.lt.s32.totalorder %s733_s26, %s1054_s1 }
  0x29   : > { %v180_v11 = vor.u32 1.1754944e-38, %v179_v6  ;;  %vm178_vm3 = vcmp.eq.f32.partialorder %v177_v8, 8.507059e+37  ;;  %p740_p8 = scmp.lt.s32.totalorder %s738_s30, %s734_s27 }
  0x2a   : > { %v163_v20 = vmul.f32 %v162_v15, %v160_v9  ;;  %p736_p5 = pnand %p735_p4, %p867_p9 }
  0x2b   : > { %p741_p10 = por %p740_p8, %p739_p7 }
  0x2c   : > { %v165_v27 = vsel %vm161_vm4, %v163_v20, %v164_v21  ;;  %p737_p6 = pneg %p736_p5 }
  0x2d   : > { %v677_v3 = vpop.eup %676  ;;  %v187_v30 = vmul.f32 3.0, %v165_v27  ;;  %v234_v62 = vmul.f32 -1.5371516, %v165_v27  ;;  %v250_v0 = vmul.f32 1.87599, %v165_v27 }
  0x2e   : > { %v169_v5 = vmul.f32 %v677_v3, %v167_v2  ;;  %vm174_vm1 = vweird.f32 %v677_v3  ;;  %v263_v1 = vmul.f32 -0.20404133, %v165_v27  ;;  %p742_p13 = pnand %p741_p10, %p737_p6 }
  0x2f   : > { %vm175_vm2 = vmor %vm173_vm0, %vm174_vm1 }
  0x30   : > { %v170_v7 = vsub.f32 1.0, %v169_v5 }
  0x32   : > { %v171_v10 = vmul.f32 %v677_v3, %v170_v7 }
  0x34   : > { %v172_v12 = vadd.f32 %v677_v3, %v171_v10 }
  0x36   : > { %v176_v16 = vsel %vm175_vm2, %v677_v3, %v172_v12 }
  0x37   : > { %v181_v17 = vsel %vm178_vm3, %v180_v11, %v176_v16 }
  0x38   : > { %v183_v18 = vmul.f32 %v382_v13, %v181_v17  ;;  %v185_v19 = vmul.f32 %v383_v14, %v181_v17 }
  0x3a   : > { %v186_v22 = vadd.f32 0.4683363, %v185_v19  ;;  %v184_v23 = vadd.f32 0.19783983, %v183_v18 }
  0x3c   : > { %v197_v24 = vmul.f32 12.0, %v186_v22  ;;  %v188_v25 = vmul.f32 5.0, %v186_v22  ;;  %v214_v26 = vadd.f32 2.220446e-16, %v186_v22  ;;  %v193_v29 = vmul.f32 15.0, %v184_v23 }
  0x3d   : > { %v385_v35 = vadd.f32 -4.0, %v184_v23 }
  0x3e   : > { %v198_v28 = vadd.f32 2.220446e-16, %v197_v24  ;;  %678 = vrcp.f32 %v214_v26  ;;  %v384_v31 = vadd.f32 -3.0, %v188_v25  ;;  %v194_v32 = vmul.f32 %v193_v29, %v186_v22 }
  0x3f   : > { %vm220_vm5 = vweird.f32 %v214_v26  ;;  %v224_v40 = vand.u32 2147483647, %v214_v26  ;;  %v226_v41 = vand.u32 2147483648, %v214_v26 }
  0x40   : > { %680 = vrcp.f32 %v198_v28  ;;  %v190_v34 = vmul.f32 %v384_v31, %v187_v30  ;;  %v195_v38 = vmul.f32 %v194_v32, %v165_v27  ;;  %vm204_vm6 = vweird.f32 %v198_v28 }
  0x41   : > { %v210_v42 = vand.u32 2147483648, %v198_v28  ;;  %v208_v46 = vand.u32 2147483647, %v198_v28  ;;  %v227_v49 = vor.u32 1.1754944e-38, %v226_v41  ;;  %vm225_vm11 = vcmp.eq.f32.partialorder %v224_v40, 8.507059e+37 }
  0x42   : > { %v192_v44 = vmul.f32 %v385_v35, %v190_v34 }
  0x43   : > { %v211_v50 = vor.u32 1.1754944e-38, %v210_v42  ;;  %vm209_vm12 = vcmp.eq.f32.partialorder %v208_v46, 8.507059e+37 }
  0x44   : > { %v679_v33 = vpop.eup %678  ;;  %v196_v52 = vsub.f32 %v192_v44, %v195_v38 }
  0x45   : > { %v216_v37 = vmul.f32 %v679_v33, %v214_v26  ;;  %vm221_vm7 = vweird.f32 %v679_v33 }
  0x46   : > { %v681_v36 = vpop.eup %680  ;;  %vm222_vm9 = vmor %vm220_vm5, %vm221_vm7 }
  0x47   : > { %v200_v39 = vmul.f32 %v681_v36, %v198_v28  ;;  %v217_v43 = vsub.f32 1.0, %v216_v37  ;;  %vm205_vm8 = vweird.f32 %v681_v36 }
  0x48   : > { %vm206_vm10 = vmor %vm204_vm6, %vm205_vm8 }
  0x49   : > { %v201_v45 = vsub.f32 1.0, %v200_v39  ;;  %v218_v47 = vmul.f32 %v679_v33, %v217_v43 }
  0x4b   : > { %v202_v48 = vmul.f32 %v681_v36, %v201_v45  ;;  %v219_v51 = vadd.f32 %v679_v33, %v218_v47 }
  0x4d   : > { %v203_v53 = vadd.f32 %v681_v36, %v202_v48  ;;  %v223_v54 = vsel %vm222_vm9, %v679_v33, %v219_v51 }
  0x4e   : > { %v228_v56 = vsel %vm225_vm11, %v227_v49, %v223_v54 }
  0x4f   : > { %v207_v55 = vsel %vm206_vm10, %v681_v36, %v203_v53  ;;  %v229_v59 = vmul.f32 %v228_v56, %v190_v34 }
  0x50   : > { %v212_v57 = vsel %vm209_vm12, %v211_v50, %v207_v55 }
  0x51   : > { %v213_v58 = vmul.f32 %v212_v57, %v196_v52 }
  0x53   : > { %v230_v60 = vmul.f32 3.0, %v213_v58  ;;  %v236_v2 = vmul.f32 -0.49853632, %v213_v58  ;;  %v252_v3 = vmul.f32 0.041555926, %v213_v58 }
  0x54   : > { %v265_v4 = vmul.f32 1.057311, %v213_v58 }
  0x55   : > { %v231_v61 = vadd.f32 %v230_v60, %v229_v59 }
  0x57   : > { %v232_v63 = vsub.f32 0.0, %v231_v61 }
  0x59   : > { %v233_v5 = vmul.f32 3.2404814, %v232_v63  ;;  %v249_v6 = vmul.f32 -0.969255, %v232_v63  ;;  %v262_v7 = vmul.f32 0.05564664, %v232_v63 }
  0x5b   : > { %v235_v8 = vadd.f32 %v234_v62, %v233_v5  ;;  %v251_v9 = vadd.f32 %v250_v0, %v249_v6  ;;  %v264_v10 = vadd.f32 %v263_v1, %v262_v7 }
  0x5d   : > { %v901_v11 = vadd.f32 %v236_v2, %v235_v8  ;;  %v903_v12 = vadd.f32 %v252_v3, %v251_v9  ;;  %v905_v13 = vadd.f32 %v265_v4, %v264_v10 }
  0x5f   : > { %v908_v14 = vand.u32 2147483647, %v901_v11  ;;  %v911_v15 = vand.u32 2147483647, %v903_v12  ;;  %v914_v16 = vand.u32 2147483647, %v905_v13 }
  0x60   : > { %vm447_vm12 = vcmp.lt.f32.partialorder %v901_v11, 0 }
  0x61   : > { %v406_v17 = vand.u32 8388607, %v908_v14  ;;  %v477_v18 = vand.u32 8388607, %v911_v15  ;;  %v548_v19 = vand.u32 8388607, %v914_v16  ;;  %vm440_vm1 = vweird.f32 %v908_v14 }
  0x62   : > { %v402_v33 = vand.u32 2139095040, %v908_v14  ;;  %v473_v35 = vand.u32 2139095040, %v911_v15  ;;  %v544_v55 = vand.u32 2139095040, %v914_v16  ;;  %vm437_vm0 = vcmp.eq.f32.partialorder %v908_v14, 1.0 }
  0x63   : > { %v407_v20 = vor.u32 8388608, %v406_v17  ;;  %v478_v21 = vor.u32 8388608, %v477_v18  ;;  %v549_v24 = vor.u32 8388608, %v548_v19  ;;  %vm439_vm2 = vcmp.lt.f32.partialorder %v908_v14, 0.0 }
  0x64   : > { %v403_v44 = vshrl.u32 %v402_v33, 23  ;;  %v474_v45 = vshrl.u32 %v473_v35, 23  ;;  %v545_v4 = vshrl.u32 %v544_v55, 23  ;;  %vm511_vm3 = vweird.f32 %v911_v15 }
  0x65   : > { %v409_v22 = vand.u32 8388607, %v407_v20  ;;  %v480_v23 = vand.u32 8388607, %v478_v21  ;;  %v551_v27 = vand.u32 8388607, %v549_v24  ;;  %vm582_vm8 = vweird.f32 %v914_v16 }
  0x66   : > { %v465_v57 = vadd.s32 4294967169, %v403_v44  ;;  %v536_v58 = vadd.s32 4294967169, %v474_v45  ;;  %vm438_vm4 = vcmp.eq.f32.partialorder %v908_v14, 0.0  ;;  %vm510_vm5 = vcmp.lt.f32.partialorder %v911_v15, 0.0 }
  0x67   : > { %v410_v25 = vor.u32 1065353216, %v409_v22  ;;  %v919_v26 = vor.u32 1065353216, %v480_v23  ;;  %v923_v30 = vor.u32 1065353216, %v551_v27  ;;  %vm509_vm6 = vcmp.eq.f32.partialorder %v911_v15, 0.0 }
  0x68   : > { %v414_v5 = vadd.s32 1, %v465_v57  ;;  %v485_v17 = vadd.s32 1, %v536_v58  ;;  %vm508_vm7 = vcmp.eq.f32.partialorder %v911_v15, 1.0  ;;  %vm581_vm9 = vcmp.lt.f32.partialorder %v914_v16, 0.0 }
  0x69   : > { %vm411_vm13 = vcmp.ge.f32.partialorder %v410_v25, 1.4142135  ;;  %v412_v28 = vmul.f32 0.5, %v410_v25  ;;  %vm482_vm14 = vcmp.ge.f32.partialorder %v919_v26, 1.4142135  ;;  %v483_v29 = vmul.f32 0.5, %v919_v26 }
  0x6a   : > { %vm553_vm15 = vcmp.ge.f32.partialorder %v923_v30, 1.4142135  ;;  %v554_v37 = vmul.f32 0.5, %v923_v30  ;;  %v415_v23 = vsel %vm411_vm13, %v414_v5, %v465_v57  ;;  %vm580_vm10 = vcmp.eq.f32.partialorder %v914_v16, 0.0 }
  0x6b   : > { %v413_v31 = vsel %vm411_vm13, %v412_v28, %v410_v25  ;;  %v484_v32 = vsel %vm482_vm14, %v483_v29, %v919_v26  ;;  %vm579_vm11 = vcmp.eq.f32.partialorder %v914_v16, 1.0  ;;  %vm448_vm13 = vcmp.eq.f32.partialorder %v901_v11, 0 }
  0x6c   : > { %v930_v34 = vadd.f32 -1.0, %v413_v31  ;;  %v933_v36 = vadd.f32 -1.0, %v484_v32  ;;  %v555_v40 = vsel %vm553_vm15, %v554_v37, %v923_v30  ;;  %v486_v31 = vsel %vm482_vm14, %v485_v17, %v536_v58 }
  0x6d   : > { %v944_v43 = vadd.f32 -1.0, %v555_v40  ;;  %v607_v32 = vadd.s32 4294967169, %v545_v4  ;;  %v506_v44 = vcvt.s32.f32 %v486_v31  ;;  %vm518_vm14 = vcmp.lt.f32.partialorder %v903_v12, 0 }
  0x6e   : > { %v417_v38 = vmul.f32 %v930_v34, %v930_v34  ;;  %v488_v39 = vmul.f32 %v933_v36, %v933_v36 }
  0x6f   : > { %v559_v50 = vmul.f32 %v944_v43, %v944_v43 }
  0x70   : > { %v418_v41 = vmul.f32 0.12621109, %v417_v38  ;;  %v420_v42 = vmul.f32 -0.20706727, %v417_v38  ;;  %v489_v46 = vmul.f32 0.12621109, %v488_v39 }
  0x71   : > { %v491_v47 = vmul.f32 -0.20706727, %v488_v39  ;;  %v560_v56 = vmul.f32 0.12621109, %v559_v50  ;;  %v562_v8 = vmul.f32 -0.20706727, %v559_v50 }
  0x72   : > { %v419_v48 = vadd.f32 0.21545328, %v418_v41  ;;  %v421_v49 = vadd.f32 -0.23896284, %v420_v42  ;;  %v490_v51 = vadd.f32 0.21545328, %v489_v46  ;;  %v435_v41 = vcvt.s32.f32 %v415_v23 }
  0x73   : > { %v492_v52 = vadd.f32 -0.23896284, %v491_v47  ;;  %v561_v63 = vadd.f32 0.21545328, %v560_v56  ;;  %v563_v28 = vadd.f32 -0.23896284, %v562_v8 }
  0x74   : > { %v422_v53 = vmul.f32 %v419_v48, %v417_v38  ;;  %v424_v54 = vmul.f32 %v421_v49, %v417_v38  ;;  %v493_v59 = vmul.f32 %v490_v51, %v488_v39  ;;  %v242_v23 = vmul.f32 12.92, %v901_v11 }
  0x75   : > { %v495_v60 = vmul.f32 %v492_v52, %v488_v39  ;;  %v564_v18 = vmul.f32 %v561_v63, %v559_v50  ;;  %v566_v37 = vmul.f32 %v563_v28, %v559_v50  ;;  %v258_v28 = vmul.f32 12.92, %v903_v12 }
  0x76   : > { %v423_v61 = vadd.f32 0.28795174, %v422_v53  ;;  %v425_v62 = vadd.f32 -0.3607037, %v424_v54  ;;  %v494_v0 = vadd.f32 0.28795174, %v493_v59 }
  0x77   : > { %v496_v1 = vadd.f32 -0.3607037, %v495_v60  ;;  %v565_v33 = vadd.f32 0.28795174, %v564_v18  ;;  %v567_v45 = vadd.f32 -0.3607037, %v566_v37 }
  0x78   : > { %v426_v2 = vmul.f32 %v423_v61, %v417_v38  ;;  %v428_v3 = vmul.f32 %v425_v62, %v417_v38  ;;  %v497_v6 = vmul.f32 %v494_v0, %v488_v39 }
  0x79   : > { %v499_v7 = vmul.f32 %v496_v1, %v488_v39  ;;  %v568_v42 = vmul.f32 %v565_v33, %v559_v50  ;;  %v570_v47 = vmul.f32 %v567_v45, %v559_v50 }
  0x7a   : > { %v427_v9 = vadd.f32 0.48090908, %v426_v2  ;;  %v429_v10 = vadd.f32 -0.72134733, %v428_v3  ;;  %v498_v19 = vadd.f32 0.48090908, %v497_v6 }
  0x7b   : > { %v500_v20 = vadd.f32 -0.72134733, %v499_v7  ;;  %v569_v46 = vadd.f32 0.48090908, %v568_v42 }
  0x7c   : > { %v430_v21 = vmul.f32 %v427_v9, %v417_v38  ;;  %v432_v22 = vmul.f32 %v930_v34, %v429_v10  ;;  %v501_v24 = vmul.f32 %v498_v19, %v488_v39  ;;  %v556_v39 = vadd.s32 1, %v607_v32 }
  0x7d   : > { %v503_v27 = vmul.f32 %v933_v36, %v500_v20  ;;  %v572_v49 = vmul.f32 %v569_v46, %v559_v50  ;;  %v244_v19 = vlaneseq }
  0x7e   : > { %v431_v29 = vadd.f32 1.442695, %v430_v21  ;;  %v502_v35 = vadd.f32 1.442695, %v501_v24 }
  0x7f   : > { %v573_v53 = vadd.f32 1.442695, %v572_v49 }
  0x80   : > { %v433_v40 = vadd.f32 %v432_v22, %v431_v29  ;;  %v504_v38 = vadd.f32 %v503_v27, %v502_v35 }
  0x82   : > { %v434_v25 = vmul.f32 %v930_v34, %v433_v40  ;;  %v505_v26 = vmul.f32 %v933_v36, %v504_v38  ;;  %v571_v34 = vadd.f32 -0.72134733, %v570_v47  ;;  %v557_v36 = vsel %vm553_vm15, %v556_v39, %v607_v32 }
  0x83   : > { %v577_v61 = vcvt.s32.f32 %v557_v36  ;;  %vm452_vm15 = vcmp.eq.f32.partialorder %v908_v14, 2139095040  ;;  %v271_v38 = vmul.f32 12.92, %v905_v13 }
  0x84   : > { %v436_v48 = vadd.f32 %v435_v41, %v434_v25  ;;  %v507_v51 = vadd.f32 %v506_v44, %v505_v26  ;;  %v574_v50 = vmul.f32 %v944_v43, %v571_v34 }
  0x86   : > { %v441_v52 = vsel %vm440_vm1, %v908_v14, %v436_v48  ;;  %v512_v55 = vsel %vm511_vm3, %v911_v15, %v507_v51  ;;  %v575_v60 = vadd.f32 %v574_v50, %v573_v53  ;;  %vm460_vm1 = vcmp.ne.f32.partialorder %v901_v11, %v901_v11 }
  0x87   : > { %v442_v54 = vsel %vm439_vm2, nan, %v441_v52  ;;  %v513_v57 = vsel %vm510_vm5, nan, %v512_v55  ;;  %vm523_vm2 = vcmp.eq.f32.partialorder %v911_v15, 2139095040  ;;  %vm449_vm3 = vcmp.eq.f32.partialorder %v901_v11, 1065353216 }
  0x88   : > { %v443_v56 = vsel %vm438_vm4, -inf, %v442_v54  ;;  %v514_v59 = vsel %vm509_vm6, -inf, %v513_v57  ;;  %v576_v0 = vmul.f32 %v944_v43, %v575_v60  ;;  %vm531_vm4 = vcmp.ne.f32.partialorder %v903_v12, %v903_v12 }
  0x89   : > { %v444_v58 = vsel %vm437_vm0, 0.0, %v443_v56  ;;  %v515_v63 = vsel %vm508_vm7, 0.0, %v514_v59  ;;  %vm519_vm0 = vcmp.eq.f32.partialorder %v903_v12, 0  ;;  %vm520_vm5 = vcmp.eq.f32.partialorder %v903_v12, 1065353216 }
  0x8a   : > { %v445_v62 = vmul.f32 0.41666666, %v444_v58  ;;  %v516_v30 = vmul.f32 0.41666666, %v515_v63  ;;  %v578_v1 = vadd.f32 %v577_v61, %v576_v0  ;;  %vm238_vm6 = vcmp.gt.f32.partialorder %v901_v11, 0.0031308 }
  0x8b   : > { %vm589_vm7 = vcmp.lt.f32.partialorder %v905_v13, 0 }
  0x8c   : > { %682 = vpow2.f32 %v445_v62  ;;  %v583_v2 = vsel %vm582_vm8, %v914_v16, %v578_v1  ;;  %vm994_vm8 = vcmp.lt.s32.totalorder %v244_v19, 256 }
  0x8d   : > { %684 = vpow2.f32 %v516_v30  ;;  %v584_v3 = vsel %vm581_vm9, nan, %v583_v2  ;;  %vm254_vm9 = vcmp.gt.f32.partialorder %v903_v12, 0.0031308 }
  0x8e   : > { %v585_v43 = vsel %vm580_vm10, -inf, %v584_v3  ;;  %vm590_vm10 = vcmp.eq.f32.partialorder %v905_v13, 0 }
  0x8f   : > { %v586_v5 = vsel %vm579_vm11, 0.0, %v585_v43  ;;  %vm594_vm11 = vcmp.eq.f32.partialorder %v914_v16, 2139095040 }
  0x90   : > { %v587_v8 = vmul.f32 0.41666666, %v586_v5 }
  0x92   : > { %v683_v4 = vpop.eup %682  ;;  %686 = vpow2.f32 %v587_v8 }
  0x93   : > { %v685_v6 = vpop.eup %684  ;;  %v453_v7 = vsel %vm447_vm12, 2143289344, %v683_v4  ;;  %vm602_vm12 = vcmp.ne.f32.partialorder %v905_v13, %v905_v13 }
  0x94   : > { %v454_v9 = vsel %vm448_vm13, 0, %v453_v7  ;;  %v524_v10 = vsel %vm518_vm14, 2143289344, %v685_v6  ;;  %vm591_vm13 = vcmp.eq.f32.partialorder %v905_v13, 1065353216  ;;  %vm267_vm14 = vcmp.gt.f32.partialorder %v905_v13, 0.0031308 }
  0x95   : > { %v459_v17 = vsel %vm452_vm15, 2139095040, %v454_v9  ;;  %v525_v14 = vsel %vm519_vm0, 0, %v524_v10 }
  0x96   : > { %v463_v18 = vsel %vm460_vm1, 2143289344, %v459_v17  ;;  %v530_v20 = vsel %vm523_vm2, 2139095040, %v525_v14 }
  0x97   : > { %v464_v15 = vsel %vm449_vm3, 1065353216, %v463_v18  ;;  %v534_v21 = vsel %vm531_vm4, 2143289344, %v530_v20 }
  0x98   : > { %v240_v22 = vmul.f32 1.055, %v464_v15  ;;  %v535_v24 = vsel %vm520_vm5, 1065353216, %v534_v21  ;;  %v687_v32 = vpop.eup %686 }
  0x99   : > { %v256_v27 = vmul.f32 1.055, %v535_v24  ;;  %v595_v37 = vsel %vm589_vm7, 2143289344, %v687_v32 }
  0x9a   : > { %v386_v29 = vadd.f32 -0.055, %v240_v22  ;;  %v596_v12 = vsel %vm590_vm10, 0, %v595_v37 }
  0x9b   : > { %v387_v33 = vadd.f32 -0.055, %v256_v27  ;;  %v601_v16 = vsel %vm594_vm11, 2139095040, %v596_v12 }
  0x9c   : > { %v243_v35 = vsel %vm238_vm6, %v386_v29, %v242_v23  ;;  %v605_v11 = vsel %vm602_vm12, 2143289344, %v601_v16 }
  0x9d   : > { %248 = vst.msk [vmem:[%s153_s9] sm:$0x3] %vm994_vm8, %v243_v35  ;;  %v259_v40 = vsel %vm254_vm9, %v387_v33, %v258_v28  ;;  %v606_v41 = vsel %vm591_vm13, 1065353216, %v605_v11 }
  0x9e   : > { %388 = vst.msk [vmem:[%s153_s9 + $0x2] sm:$0x3] %vm994_vm8, %v259_v40  ;;  %v269_v42 = vmul.f32 1.055, %v606_v41 }
  0xa0   : > { %v389_v44 = vadd.f32 -0.055, %v269_v42 }
  0xa2   : > { %v272_v45 = vsel %vm267_vm14, %v389_v44, %v271_v38 }
  0xa3   : > { %390 = vst.msk [vmem:[%s153_s9 + $0x4] sm:$0x3] %vm994_vm8, %v272_v45 }
  0xa4   : > { %745 = shalt.err (!%p742_p13)
}
  0xa5   : > { %s804_s4 = smov 32   ;;  %s805_s5 = smov 2  }
  0xa6   : > { %612 = dma.vmem_to_hbm [thread:$0]  (%p867_p9), %s290_s23, 96, %s292_s24, %s276_s25, %s804_s4, %s804_s4, %s805_s5  }
  0xa7 PF: > { %s306_s12 = sand.u32 1, %s780_s6   ;;  %p619_p0 = pnand %p380_p12, %p874_p11 }
  0xa8   : > { %s307_s13 = scalar_lea.sflag [#allocation4], %s306_s12 }
  0xa9   : > { %p620_p1 = pneg %p619_p0 }
  0xab   : > { %775 = dma.done.wait (%p620_p1), %s307_s13, 96  }
  0xac   : > { %777 = vsyncadd (%p620_p1), %s307_s13, 4294967200  ;;  %s17_s11 = sadd.s32 1, %s800_s11   ;;  %s1061_s6 = smov %s784_s7 }
  0xad   : > { %p14_p2 = scmp.ge.s32.totalorder %s17_s11, 4   ;;  %s1062_s7 = smov %s788_s8 }
  0xae   : > { %s1063_s8 = smov %s872_s20  ;;  %s1064_s9 = smov %s796_s10 }
  0xaf   : > { %s1065_s10 = smov %s1067_s14  ;;  %16 = sbr.rel (!%p14_p2) target bundleno = 6 (0x6), region = 73 }
  0xb4   :  { %313 = vsyncpa [#allocation3], 1 }
  0xb5   :  { %315 = vsyncpa [#allocation3 + $0x1], 1 }
  0xb6   :  { %316 = vsyncpa [#allocation4], 1 }
  0xb7   :  { %318 = vsyncpa [#allocation4 + $0x1], 1 }

</bundles_post_ra>
